<compile_context>
chip_gen: v6e
topology: v6e:2x2x1
jax: 0.10.0
libtpu: 0.0.40
codegen_flags: <defaults>
</compile_context>

<pallas_src>
import jax
import jax.numpy as jnp
from jax.experimental import pallas as pl
from jax.experimental.pallas import tpu as pltpu


def _make_kernel(H, W, pad):
    """3x3 'same' conv + bias + ReLU on two flattened (N, H*W) batches."""
    HW = H * W

    def kernel(w_ref, b_ref, x_ref, y_ref, ox_ref, oy_ref, c_ref, l_ref, r_ref):
        # w_ref : (9,)  conv weights, SMEM (scalar reads)
        # b_ref : (1,)  conv bias,    SMEM
        # x_ref, y_ref  : (N, H*W) flattened inputs, VMEM
        # ox_ref, oy_ref: (N, H*W) flattened outputs, VMEM (lane-dense)
        # c_ref/l_ref/r_ref: (2N, pad + H*W + pad) f32 scratch slabs:
        #   center / left-valid (col!=W-1 kept) / right-valid (col!=0 kept).
        N = x_ref.shape[0]
        n2 = 2 * N

        # Column masks, computed once and applied once at fill time.
        lane = jax.lax.broadcasted_iota(jnp.int32, (N, HW), 1)
        if W & (W - 1) == 0:
            col = lane & (W - 1)          # W power of two: cheap bit-and
        else:
            col = lane % W
        not_first = col != 0              # source rows valid for dw = +1 taps
        not_last = col != (W - 1)         # source rows valid for dw = -1 taps

        xv = x_ref[...].astype(jnp.float32)
        yv = y_ref[...].astype(jnp.float32)

        # Zero only the halo lanes (data region is fully overwritten below).
        zero_halo = jnp.zeros((n2, pad), jnp.float32)
        for s_ref in (c_ref, l_ref, r_ref):
            s_ref[:, 0:pad] = zero_halo
            s_ref[:, pad + HW:pad + HW + pad] = zero_halo

        # Fill the data region: both batches stacked along sublanes so the
        # shared-weight MACs run once over (2N, HW).
        c_ref[0:N, pad:pad + HW] = xv
        c_ref[N:n2, pad:pad + HW] = yv
        l_ref[0:N, pad:pad + HW] = jnp.where(not_last, xv, 0.0)
        l_ref[N:n2, pad:pad + HW] = jnp.where(not_last, yv, 0.0)
        r_ref[0:N, pad:pad + HW] = jnp.where(not_first, xv, 0.0)
        r_ref[N:n2, pad:pad + HW] = jnp.where(not_first, yv, 0.0)

        # 3x3 conv with padding=1 as 9 statically-shifted VPU MACs.
        # In flat layout, x[i+dh, j+dw] == x_flat[p + dh*W + dw]; row halos
        # land in the zero pads, column wrap-around is already zeroed in the
        # pre-masked slabs, so each tap is just a shifted load + MAC.
        acc = jnp.zeros((n2, HW), jnp.float32)
        for dh in (-1, 0, 1):
            for dw, src in ((-1, l_ref), (0, c_ref), (1, r_ref)):
                tap = w_ref[(dh + 1) * 3 + (dw + 1)]
                off = pad + dh * W + dw
                acc = acc + tap * src[:, off:off + HW]

        acc = jnp.maximum(acc + b_ref[0], 0.0)
        ox_ref[...] = acc[0:N].astype(ox_ref.dtype)
        oy_ref[...] = acc[N:n2].astype(oy_ref.dtype)

    return kernel


@jax.jit
def _multi_input_forward(weight, bias, x, y):
    """x, y: (N, 1, H, W). Returns (conv_relu(x), conv_relu(y)), same shapes."""
    N, C, H, W = x.shape
    assert C == 1 and y.shape == x.shape
    HW = H * W
    # Lane-aligned halo (>= W+1, multiple of 128): keeps every shifted slice
    # in-bounds and the data region starting on a 128-lane boundary.
    pad = max(128, ((W + 1 + 127) // 128) * 128)

    xf = x.reshape(N, HW)      # metadata-only reshape
    yf = y.reshape(N, HW)

    kernel = _make_kernel(H, W, pad)
    slab = pltpu.VMEM((2 * N, pad + HW + pad), jnp.float32)

    ox, oy = pl.pallas_call(
        kernel,
        out_shape=(jax.ShapeDtypeStruct((N, HW), x.dtype),
                   jax.ShapeDtypeStruct((N, HW), y.dtype)),
        in_specs=[
            pl.BlockSpec(memory_space=pltpu.MemorySpace.SMEM),   # weight (9,)
            pl.BlockSpec(memory_space=pltpu.MemorySpace.SMEM),   # bias (1,)
            pl.BlockSpec(memory_space=pltpu.MemorySpace.VMEM),   # x (N, H*W)
            pl.BlockSpec(memory_space=pltpu.MemorySpace.VMEM),   # y (N, H*W)
        ],
        out_specs=(pl.BlockSpec(memory_space=pltpu.MemorySpace.VMEM),
                   pl.BlockSpec(memory_space=pltpu.MemorySpace.VMEM)),
        scratch_shapes=[slab, slab, slab],
    )(weight.reshape(-1), bias, xf, yf)

    return ox.reshape(N, C, H, W), oy.reshape(N, C, H, W)


class MultiInputNetPallas:
    """features = Conv2d(1, 1, k=3, s=1, p=1) + ReLU; shared across both inputs."""

    def __init__(self, key):
        kw, kb = jax.random.split(key)
        # Mirrors PyTorch's uniform(-1/sqrt(fan_in), 1/sqrt(fan_in)), fan_in = 9.
        bound = 1.0 / jnp.sqrt(9.0)
        self.weight = jax.random.uniform(kw, (3, 3), jnp.float32, -bound, bound)
        self.bias = jax.random.uniform(kb, (1,), jnp.float32, -bound, bound)

    def __call__(self, x, y):
        return _multi_input_forward(self.weight, self.bias, x, y)


if __name__ == "__main__":
    key = jax.random.PRNGKey(0)
    k_params, kx, ky = jax.random.split(key, 3)

    net = MultiInputNetPallas(k_params)

    N, C, H, W = 2, 1, 16, 16
    x = jax.random.normal(kx, (N, C, H, W), jnp.float32)
    y = jax.random.normal(ky, (N, C, H, W), jnp.float32)

    x1, x2 = net(x, y)
    jax.block_until_ready((x1, x2))

    # Self-check against a pure-JAX reference (same math: conv(1,1,3,p=1)+ReLU).
    def ref_fwd(inp):
        out = jax.lax.conv_general_dilated(
            inp, net.weight.reshape(1, 1, 3, 3), (1, 1), "SAME",
            dimension_numbers=("NCHW", "OIHW", "NCHW"),
            precision=jax.lax.Precision.HIGHEST)
        return jnp.maximum(out + net.bias.reshape(1, 1, 1, 1), 0.0)

    r1, r2 = ref_fwd(x), ref_fwd(y)
    assert x1.shape == (N, C, H, W) and x2.shape == (N, C, H, W)
    assert x1.dtype == jnp.float32 and x2.dtype == jnp.float32
    assert bool(jnp.allclose(x1, r1, atol=1e-5, rtol=1e-5))
    assert bool(jnp.allclose(x2, r2, atol=1e-5, rtol=1e-5))
    print("KERNEL_OK")
</pallas_src>

<mosaic_0001>
module attributes {stable_mosaic.version = 11 : i64} {
  func.func @kernel(%arg0: memref<9xf32, #tpu.memory_space<smem>>, %arg1: memref<1xf32, #tpu.memory_space<smem>>, %arg2: memref<2x256xf32, #tpu.memory_space<vmem>>, %arg3: memref<2x256xf32, #tpu.memory_space<vmem>>, %arg4: memref<2x256xf32, #tpu.memory_space<vmem>>, %arg5: memref<2x256xf32, #tpu.memory_space<vmem>>, %arg6: memref<4x512xf32, #tpu.memory_space<vmem>>, %arg7: memref<4x512xf32, #tpu.memory_space<vmem>>, %arg8: memref<4x512xf32, #tpu.memory_space<vmem>>) attributes {dimension_semantics = [], scalar_prefetch = 0 : i64, scratch_operands = 3 : i64, tpu.core_type = #tpu.core_type<tc>} {
    %0 = tpu.iota {dimensions = array<i32: 1>} : vector<2x256xi32>
    %c15_i32 = arith.constant 15 : i32
    %1 = vector.broadcast %c15_i32 : i32 to vector<2x256xi32>
    %2 = arith.andi %0, %1 : vector<2x256xi32>
    %c0_i32 = arith.constant 0 : i32
    %3 = vector.broadcast %c0_i32 : i32 to vector<2x256xi32>
    %4 = arith.cmpi ne, %2, %3 : vector<2x256xi32>
    %c15_i32_0 = arith.constant 15 : i32
    %5 = vector.broadcast %c15_i32_0 : i32 to vector<2x256xi32>
    %6 = arith.cmpi ne, %2, %5 : vector<2x256xi32>
    %c0 = arith.constant 0 : index
    %c0_1 = arith.constant 0 : index
    %7 = vector.load %arg2[%c0, %c0_1] : memref<2x256xf32, #tpu.memory_space<vmem>>, vector<2x256xf32>
    %c0_2 = arith.constant 0 : index
    %c0_3 = arith.constant 0 : index
    %8 = vector.load %arg3[%c0_2, %c0_3] : memref<2x256xf32, #tpu.memory_space<vmem>>, vector<2x256xf32>
    %cst = arith.constant 0.000000e+00 : f32
    %9 = vector.broadcast %cst : f32 to vector<4x128xf32>
    %c0_4 = arith.constant 0 : index
    %c0_5 = arith.constant 0 : index
    %10 = vector.load %arg6[%c0_4, %c0_5] : memref<4x512xf32, #tpu.memory_space<vmem>>, vector<4x128xf32>
    tpu.vector_store %arg6[%c0_4, %c0_5], %9 {strides = array<i32>} : memref<4x512xf32, #tpu.memory_space<vmem>>, vector<4x128xf32>,
    %c0_6 = arith.constant 0 : index
    %c384 = arith.constant 384 : index
    %11 = vector.load %arg6[%c0_6, %c384] : memref<4x512xf32, #tpu.memory_space<vmem>>, vector<4x128xf32>
    tpu.vector_store %arg6[%c0_6, %c384], %9 {strides = array<i32>} : memref<4x512xf32, #tpu.memory_space<vmem>>, vector<4x128xf32>,
    %c0_7 = arith.constant 0 : index
    %c0_8 = arith.constant 0 : index
    %12 = vector.load %arg7[%c0_7, %c0_8] : memref<4x512xf32, #tpu.memory_space<vmem>>, vector<4x128xf32>
    tpu.vector_store %arg7[%c0_7, %c0_8], %9 {strides = array<i32>} : memref<4x512xf32, #tpu.memory_space<vmem>>, vector<4x128xf32>,
    %c0_9 = arith.constant 0 : index
    %c384_10 = arith.constant 384 : index
    %13 = vector.load %arg7[%c0_9, %c384_10] : memref<4x512xf32, #tpu.memory_space<vmem>>, vector<4x128xf32>
    tpu.vector_store %arg7[%c0_9, %c384_10], %9 {strides = array<i32>} : memref<4x512xf32, #tpu.memory_space<vmem>>, vector<4x128xf32>,
    %c0_11 = arith.constant 0 : index
    %c0_12 = arith.constant 0 : index
    %14 = vector.load %arg8[%c0_11, %c0_12] : memref<4x512xf32, #tpu.memory_space<vmem>>, vector<4x128xf32>
    tpu.vector_store %arg8[%c0_11, %c0_12], %9 {strides = array<i32>} : memref<4x512xf32, #tpu.memory_space<vmem>>, vector<4x128xf32>,
    %c0_13 = arith.constant 0 : index
    %c384_14 = arith.constant 384 : index
    %15 = vector.load %arg8[%c0_13, %c384_14] : memref<4x512xf32, #tpu.memory_space<vmem>>, vector<4x128xf32>
    tpu.vector_store %arg8[%c0_13, %c384_14], %9 {strides = array<i32>} : memref<4x512xf32, #tpu.memory_space<vmem>>, vector<4x128xf32>,
    %c0_15 = arith.constant 0 : index
    %c128 = arith.constant 128 : index
    %16 = vector.load %arg6[%c0_15, %c128] : memref<4x512xf32, #tpu.memory_space<vmem>>, vector<2x256xf32>
    tpu.vector_store %arg6[%c0_15, %c128], %7 {strides = array<i32>} : memref<4x512xf32, #tpu.memory_space<vmem>>, vector<2x256xf32>,
    %c2 = arith.constant 2 : index
    %c128_16 = arith.constant 128 : index
    %17 = vector.load %arg6[%c2, %c128_16] : memref<4x512xf32, #tpu.memory_space<vmem>>, vector<2x256xf32>
    tpu.vector_store %arg6[%c2, %c128_16], %8 {strides = array<i32>} : memref<4x512xf32, #tpu.memory_space<vmem>>, vector<2x256xf32>,
    %cst_17 = arith.constant 0.000000e+00 : f32
    %18 = vector.broadcast %cst_17 : f32 to vector<2x256xf32>
    %19 = arith.select %6, %7, %18 : vector<2x256xi1>, vector<2x256xf32>
    %c0_18 = arith.constant 0 : index
    %c128_19 = arith.constant 128 : index
    %20 = vector.load %arg7[%c0_18, %c128_19] : memref<4x512xf32, #tpu.memory_space<vmem>>, vector<2x256xf32>
    tpu.vector_store %arg7[%c0_18, %c128_19], %19 {strides = array<i32>} : memref<4x512xf32, #tpu.memory_space<vmem>>, vector<2x256xf32>,
    %cst_20 = arith.constant 0.000000e+00 : f32
    %21 = vector.broadcast %cst_20 : f32 to vector<2x256xf32>
    %22 = arith.select %6, %8, %21 : vector<2x256xi1>, vector<2x256xf32>
    %c2_21 = arith.constant 2 : index
    %c128_22 = arith.constant 128 : index
    %23 = vector.load %arg7[%c2_21, %c128_22] : memref<4x512xf32, #tpu.memory_space<vmem>>, vector<2x256xf32>
    tpu.vector_store %arg7[%c2_21, %c128_22], %22 {strides = array<i32>} : memref<4x512xf32, #tpu.memory_space<vmem>>, vector<2x256xf32>,
    %cst_23 = arith.constant 0.000000e+00 : f32
    %24 = vector.broadcast %cst_23 : f32 to vector<2x256xf32>
    %25 = arith.select %4, %7, %24 : vector<2x256xi1>, vector<2x256xf32>
    %c0_24 = arith.constant 0 : index
    %c128_25 = arith.constant 128 : index
    %26 = vector.load %arg8[%c0_24, %c128_25] : memref<4x512xf32, #tpu.memory_space<vmem>>, vector<2x256xf32>
    tpu.vector_store %arg8[%c0_24, %c128_25], %25 {strides = array<i32>} : memref<4x512xf32, #tpu.memory_space<vmem>>, vector<2x256xf32>,
    %cst_26 = arith.constant 0.000000e+00 : f32
    %27 = vector.broadcast %cst_26 : f32 to vector<2x256xf32>
    %28 = arith.select %4, %8, %27 : vector<2x256xi1>, vector<2x256xf32>
    %c2_27 = arith.constant 2 : index
    %c128_28 = arith.constant 128 : index
    %29 = vector.load %arg8[%c2_27, %c128_28] : memref<4x512xf32, #tpu.memory_space<vmem>>, vector<2x256xf32>
    tpu.vector_store %arg8[%c2_27, %c128_28], %28 {strides = array<i32>} : memref<4x512xf32, #tpu.memory_space<vmem>>, vector<2x256xf32>,
    %cst_29 = arith.constant 0.000000e+00 : f32
    %30 = vector.broadcast %cst_29 : f32 to vector<4x256xf32>
    %c0_30 = arith.constant 0 : index
    %31 = memref.load %arg0[%c0_30] : memref<9xf32, #tpu.memory_space<smem>>
    %c0_31 = arith.constant 0 : index
    %c111 = arith.constant 111 : index
    %32 = vector.load %arg7[%c0_31, %c111] : memref<4x512xf32, #tpu.memory_space<vmem>>, vector<4x256xf32>
    %33 = vector.broadcast %31 : f32 to vector<4x256xf32>
    %34 = arith.mulf %33, %32 : vector<4x256xf32>
    %35 = arith.addf %30, %34 : vector<4x256xf32>
    %c1 = arith.constant 1 : index
    %36 = memref.load %arg0[%c1] : memref<9xf32, #tpu.memory_space<smem>>
    %c0_32 = arith.constant 0 : index
    %c112 = arith.constant 112 : index
    %37 = vector.load %arg6[%c0_32, %c112] : memref<4x512xf32, #tpu.memory_space<vmem>>, vector<4x256xf32>
    %38 = vector.broadcast %36 : f32 to vector<4x256xf32>
    %39 = arith.mulf %38, %37 : vector<4x256xf32>
    %40 = arith.addf %35, %39 : vector<4x256xf32>
    %c2_33 = arith.constant 2 : index
    %41 = memref.load %arg0[%c2_33] : memref<9xf32, #tpu.memory_space<smem>>
    %c0_34 = arith.constant 0 : index
    %c113 = arith.constant 113 : index
    %42 = vector.load %arg8[%c0_34, %c113] : memref<4x512xf32, #tpu.memory_space<vmem>>, vector<4x256xf32>
    %43 = vector.broadcast %41 : f32 to vector<4x256xf32>
    %44 = arith.mulf %43, %42 : vector<4x256xf32>
    %45 = arith.addf %40, %44 : vector<4x256xf32>
    %c3 = arith.constant 3 : index
    %46 = memref.load %arg0[%c3] : memref<9xf32, #tpu.memory_space<smem>>
    %c0_35 = arith.constant 0 : index
    %c127 = arith.constant 127 : index
    %47 = vector.load %arg7[%c0_35, %c127] : memref<4x512xf32, #tpu.memory_space<vmem>>, vector<4x256xf32>
    %48 = vector.broadcast %46 : f32 to vector<4x256xf32>
    %49 = arith.mulf %48, %47 : vector<4x256xf32>
    %50 = arith.addf %45, %49 : vector<4x256xf32>
    %c4 = arith.constant 4 : index
    %51 = memref.load %arg0[%c4] : memref<9xf32, #tpu.memory_space<smem>>
    %c0_36 = arith.constant 0 : index
    %c128_37 = arith.constant 128 : index
    %52 = vector.load %arg6[%c0_36, %c128_37] : memref<4x512xf32, #tpu.memory_space<vmem>>, vector<4x256xf32>
    %53 = vector.broadcast %51 : f32 to vector<4x256xf32>
    %54 = arith.mulf %53, %52 : vector<4x256xf32>
    %55 = arith.addf %50, %54 : vector<4x256xf32>
    %c5 = arith.constant 5 : index
    %56 = memref.load %arg0[%c5] : memref<9xf32, #tpu.memory_space<smem>>
    %c0_38 = arith.constant 0 : index
    %c129 = arith.constant 129 : index
    %57 = vector.load %arg8[%c0_38, %c129] : memref<4x512xf32, #tpu.memory_space<vmem>>, vector<4x256xf32>
    %58 = vector.broadcast %56 : f32 to vector<4x256xf32>
    %59 = arith.mulf %58, %57 : vector<4x256xf32>
    %60 = arith.addf %55, %59 : vector<4x256xf32>
    %c6 = arith.constant 6 : index
    %61 = memref.load %arg0[%c6] : memref<9xf32, #tpu.memory_space<smem>>
    %c0_39 = arith.constant 0 : index
    %c143 = arith.constant 143 : index
    %62 = vector.load %arg7[%c0_39, %c143] : memref<4x512xf32, #tpu.memory_space<vmem>>, vector<4x256xf32>
    %63 = vector.broadcast %61 : f32 to vector<4x256xf32>
    %64 = arith.mulf %63, %62 : vector<4x256xf32>
    %65 = arith.addf %60, %64 : vector<4x256xf32>
    %c7 = arith.constant 7 : index
    %66 = memref.load %arg0[%c7] : memref<9xf32, #tpu.memory_space<smem>>
    %c0_40 = arith.constant 0 : index
    %c144 = arith.constant 144 : index
    %67 = vector.load %arg6[%c0_40, %c144] : memref<4x512xf32, #tpu.memory_space<vmem>>, vector<4x256xf32>
    %68 = vector.broadcast %66 : f32 to vector<4x256xf32>
    %69 = arith.mulf %68, %67 : vector<4x256xf32>
    %70 = arith.addf %65, %69 : vector<4x256xf32>
    %c8 = arith.constant 8 : index
    %71 = memref.load %arg0[%c8] : memref<9xf32, #tpu.memory_space<smem>>
    %c0_41 = arith.constant 0 : index
    %c145 = arith.constant 145 : index
    %72 = vector.load %arg8[%c0_41, %c145] : memref<4x512xf32, #tpu.memory_space<vmem>>, vector<4x256xf32>
    %73 = vector.broadcast %71 : f32 to vector<4x256xf32>
    %74 = arith.mulf %73, %72 : vector<4x256xf32>
    %75 = arith.addf %70, %74 : vector<4x256xf32>
    %c0_42 = arith.constant 0 : index
    %76 = memref.load %arg1[%c0_42] : memref<1xf32, #tpu.memory_space<smem>>
    %77 = vector.broadcast %76 : f32 to vector<4x256xf32>
    %78 = arith.addf %75, %77 : vector<4x256xf32>
    %cst_43 = arith.constant 0.000000e+00 : f32
    %79 = vector.broadcast %cst_43 : f32 to vector<4x256xf32>
    %80 = arith.maximumf %78, %79 : vector<4x256xf32>
    %81 = vector.extract_strided_slice %80 {offsets = [0, 0], sizes = [2, 256], strides = [1, 1]} : vector<4x256xf32> to vector<2x256xf32>
    %c0_44 = arith.constant 0 : index
    %c0_45 = arith.constant 0 : index
    %82 = vector.load %arg4[%c0_44, %c0_45] : memref<2x256xf32, #tpu.memory_space<vmem>>, vector<2x256xf32>
    tpu.vector_store %arg4[%c0_44, %c0_45], %81 {strides = array<i32>} : memref<2x256xf32, #tpu.memory_space<vmem>>, vector<2x256xf32>,
    %83 = vector.extract_strided_slice %80 {offsets = [2, 0], sizes = [2, 256], strides = [1, 1]} : vector<4x256xf32> to vector<2x256xf32>
    %c0_46 = arith.constant 0 : index
    %c0_47 = arith.constant 0 : index
    %84 = vector.load %arg5[%c0_46, %c0_47] : memref<2x256xf32, #tpu.memory_space<vmem>>, vector<2x256xf32>
    tpu.vector_store %arg5[%c0_46, %c0_47], %83 {strides = array<i32>} : memref<2x256xf32, #tpu.memory_space<vmem>>, vector<2x256xf32>,
    return
  }
}

</mosaic_0001>

<bundles_post_ra>
// kernel: _multi_input_forward.1
= control target key start
LH: loop header
LB: loop body
LE: loop exit
PB: predicated region body
PF: predicated region fallthrough
CT: control target
= control target key end

     0   :  { %12 = vsyncpa [#allocation7], 0  ;;  %s476_s0 = inlined_call_operand.vmem [shape: f32[9], index: 0, kind: input, shape index: {}]   ;;  %s477_s1 = inlined_call_operand.<no memory space> [shape: f32[1], index: 1, kind: input, shape index: {}]   ;;  %s478_s2 = inlined_call_operand.vmem [shape: f32[2,256], index: 2, kind: input, shape index: {}]   ;;  %s479_s3 = inlined_call_operand.vmem [shape: f32[2,256], index: 3, kind: input, shape index: {}]   ;;  %s480_s4 = inlined_call_operand.vmem [shape: f32[2,256], index: 4, kind: output, shape index: {0}]   ;;  %s481_s5 = inlined_call_operand.vmem [shape: f32[2,256], index: 5, kind: output, shape index: {1}]  }
   0x1   :  { %s19_s20 = sshll.u32 %s476_s0, 4  ;;  %s20_s20 = int_to_ptr.vmem [resolvable:$true] %s19_s20 }
   0x2   :  { %s344_s21 = scalar_lea.vmem %s20_s20, 16  ;;  %p349_p1 = scmp.lt.s32.totalorder %s20_s20, %s20_s20 }
   0x3   :  { %p345_p0 = scmp.ne.s32.totalorder %s20_s20, %s344_s21  ;;  %p350_p2 = scmp.lt.s32.totalorder %s344_s21, %s344_s21 }
   0x5   :  { %p351_p3 = por %p350_p2, %p349_p1 }
   0x7   :  { %p352_p4 = pnand %p351_p3, %p345_p0 }
   0x9   :  { %355 = shalt.err (!%p352_p4)
}
   0xa   :  { %s358_s22 = smov [#allocation6]  }
   0xb   :  { %22 = dma.vmem_to_smem %s20_s20, 16, %s358_s22, [#allocation7]  }
   0xc   :  { %356 = dma.done.wait [#allocation7], 16  }
   0xd   :  { %357 = vsyncadd [#allocation7], 4294967280 }
   0xe   :  { %32 = sfence }
   0xf   :  { %v321_v0 = vld.sshfl [vmem:[%s478_s2] sm:$0x33 pattern:$0x76325410]  ;;  %v33_v2 = vlaneseq  ;;  %s409_s0 = sld [smem:[#allocation6 + $0x1]]  ;;  %v359_v4 = vmov 0.0  }
  0x10   :  { %v43_v1 = vld [vmem:[%s479_s3] sm:$0xf]  ;;  %59 = vst [vmem:[#allocation2 + $0x4] sm:$0x33] %v321_v0  ;;  %44 = vst [vmem:[#allocation2] sm:$0xf] %v359_v4  ;;  %v71_v12 = vcombine.high %v321_v0, %v321_v0 }
  0x11   :  { %v61_v3 = vcombine.low %v43_v1, %v43_v1  ;;  %v360_v5 = vmov 1983009808   ;;  %v84_v7 = vshrl.u32 %v33_v2, 7  ;;  %45 = vst [vmem:[#allocation2 + $0xc] sm:$0xf] %v359_v4  ;;  %v34_v8 = vand.u32 127, %v33_v2 }
  0x12   :  { %v81_v6 = vunpack.c.l.s4 %v360_v5  ;;  %46 = vst [vmem:[#allocation3] sm:$0xf] %v359_v4  ;;  %47 = vst [vmem:[#allocation3 + $0xc] sm:$0xf] %v359_v4  ;;  %s413_s2 = sld [smem:[#allocation6 + $0x4]]  ;;  %s361_s3 = smov 127  }
  0x13   :  { %48 = vst [vmem:[#allocation4] sm:$0xf] %v359_v4  ;;  %49 = vst [vmem:[#allocation4 + $0xc] sm:$0xf] %v359_v4  ;;  %v35_v10 = vadd.s32 128, %v34_v8  ;;  %v36_v11 = vand.u32 15, %v34_v8 }
  0x14   :  { %322 = vst.sshfl [vmem:[#allocation2 + $0x4] sm:$0xf0 pattern:$0x76325410] %v61_v3  ;;  %v82_v9 = vunpack.c.0.s8 %v81_v6  ;;  %s449_s27 = sld [smem:[#allocation6 + $0x3]]  ;;  %s362_s7 = smov 111  }
  0x15   :  { %v37_v14 = vand.u32 15, %v35_v10  ;;  %vm415_vm0 = vcmp.ne.s32.totalorder %v36_v11, 15  ;;  %vm419_vm1 = vcmp.ne.s32.totalorder %v36_v11, 0  ;;  %v124_v19 = vstv %s409_s0  ;;  %s324_s28 = sld [smem:[#allocation6 + $0x2]]  ;;  %s363_s8 = smov 112  }
  0x16   :  { %v411_v13 = vsub.s32 %v82_v9, %v84_v7  ;;  %v73_v17 = vsel %vm415_vm0, %v321_v0, 0.0  ;;  %v98_v18 = vsel %vm419_vm1, %v321_v0, 0.0  ;;  %s452_s29 = sld [smem:[#allocation6 + $0x5]]  ;;  %s364_s9 = smov 126   ;;  %vm135_vm4 = vcmask 1043456  }
  0x17   :  { %vm429_vm2 = vcmp.ne.s32.totalorder %v37_v14, 15  ;;  %vm433_vm3 = vcmp.ne.s32.totalorder %v37_v14, 0  ;;  %s454_s30 = sld [smem:[#allocation6 + $0x6]]  ;;  %s365_s11 = smov 110   ;;  %vm137_vm5 = vcmask 1039360   ;;  %vm158_vm6 = vcmask 1031168  }
  0x18   :  { %v86_v20 = vrot.slane %v43_v1, %v411_v13  ;;  %v74_v23 = vsel %vm429_vm2, %v71_v12, 0.0  ;;  %v99_v24 = vsel %vm433_vm3, %v71_v12, 0.0  ;;  %v185_v39 = vstv %s413_s2  ;;  %s456_s6 = sld [smem:[#allocation6 + $0x7]]  ;;  %v239_v59 = vld [vmem:[#allocation2 + $0xc] sm:$0xf]  ;;  %s366_s12 = smov 96  }
  0x19   :  { %v77_v27 = vcombine.low %v73_v17, %v74_v23  ;;  %v102_v30 = vcombine.low %v98_v18, %v99_v24  ;;  %v219_v54 = vld [vmem:[#allocation3 + $0xc] sm:$0xf]  ;;  %s330_s10 = sld [smem:[#allocation6 + $0x8]]  ;;  %s367_s13 = smov 95   ;;  %vm177_vm7 = vcmask 916480   ;;  %vm191_vm8 = vcmask 908288  }
  0x1a   :  { %v87_v28 = vcombine.high %v86_v20, %v86_v20  ;;  %v90_v29 = vsel %vm415_vm0, %v86_v20, 0.0  ;;  %v105_v32 = vsel %vm419_vm1, %v86_v20, 0.0  ;;  %v165_v43 = vstv %s449_s27  ;;  %v199_v45 = vld [vmem:[#allocation4 + $0xc] sm:$0xf]  ;;  %s368_s14 = smov 94   ;;  %s113_s15 = sld [smem:[#allocation6]] }
  0x1b   :  { %v122_v25 = vld [vmem:[#allocation2] sm:$0xff]  ;;  %v123_v26 = vld [vmem:[#allocation2 + $0x8] sm:$0xf]  ;;  %79 = vst [vmem:[#allocation3 + $0x4] sm:$0x33] %v77_v27  ;;  %v146_v44 = vstv %s324_s28  ;;  %vm210_vm9 = vcmask 900096  }
  0x1c   :  { %v125_v31 = vmul.f32 %v124_v19, %v122_v25  ;;  %v91_v33 = vsel %vm429_vm2, %v87_v28, 0.0  ;;  %104 = vst [vmem:[#allocation4 + $0x4] sm:$0x33] %v102_v30  ;;  %v106_v34 = vsel %vm433_vm3, %v87_v28, 0.0  ;;  %v126_v35 = vmul.f32 %v124_v19, %v123_v26  ;;  %v184_v38 = vld [vmem:[#allocation2 + $0x4] sm:$0xff]  ;;  %s369_s18 = smov 17  }
  0x1d   :  { %v94_v36 = vcombine.low %v90_v29, %v91_v33  ;;  %v109_v37 = vcombine.low %v105_v32, %v106_v34  ;;  %v186_v42 = vmul.f32 %v185_v39, %v184_v38  ;;  %v200_v49 = vstv %s452_s29 }
  0x1e   :  { %129 = vrot.lane.b32.xlu0 %v125_v31, %s361_s3  ;;  %v202_v53 = vmul.f32 %v200_v49, %v199_v45  ;;  %v220_v55 = vstv %s454_s30  ;;  %v240_v56 = vstv %s456_s6  ;;  %vm230_vm10 = vcmask 785408  }
  0x1f   :  { %v95_v40 = vrot.slane %v94_v36, 6  ;;  %v110_v41 = vrot.slane %v109_v37, 6  ;;  %v222_v57 = vmul.f32 %v220_v55, %v219_v54  ;;  %v241_v58 = vmul.f32 %v240_v56, %v184_v38 }
  0x20   :  { %v242_v61 = vmul.f32 %v240_v56, %v239_v59  ;;  %v258_v0 = vstv %s330_s10  ;;  %v116_v15 = vstv %s113_s15  ;;  %vm250_vm11 = vcmask 777216  }
  0x21   :  { %97 = vst [vmem:[#allocation3 + $0x4] sm:$0xcc] %v95_v40  ;;  %112 = vst [vmem:[#allocation4 + $0x4] sm:$0xcc] %v110_v41  ;;  %v260_v2 = vmul.f32 %v258_v0, %v199_v45  ;;  %vm268_vm12 = vcmask 769024   ;;  %vm301_vm13 = vcmask 138240  }
  0x22   :  { %131 = vrot.lane.b32.xlu0 %v126_v35, %s361_s3 }
  0x26   :  { %188 = vrot.lane.b32.xlu0 %v186_v42, %s362_s7 }
  0x28   :  { %v114_v46 = vld [vmem:[#allocation3] sm:$0xff]  ;;  %v144_v47 = vld [vmem:[#allocation4] sm:$0xff]  ;;  %v145_v48 = vld [vmem:[#allocation4 + $0x8] sm:$0xf] }
  0x29   :  { %v166_v50 = vmul.f32 %v165_v43, %v114_v46  ;;  %v147_v51 = vmul.f32 %v146_v44, %v144_v47  ;;  %v148_v52 = vmul.f32 %v146_v44, %v145_v48  ;;  %v115_v60 = vld [vmem:[#allocation3 + $0x8] sm:$0xf]  ;;  %v198_v63 = vld [vmem:[#allocation4 + $0x4] sm:$0xff]  ;;  %v117_v22 = vmul.f32 %v116_v15, %v114_v46 }
  0x2a   :  { %v167_v62 = vmul.f32 %v165_v43, %v115_v60  ;;  %v201_v1 = vmul.f32 %v200_v49, %v198_v63  ;;  %v218_v3 = vld [vmem:[#allocation3 + $0x4] sm:$0xff]  ;;  %v259_v5 = vmul.f32 %v258_v0, %v198_v63  ;;  %v118_v17 = vmul.f32 %v116_v15, %v115_v60 }
  0x2b   :  { %170 = vrot.lane.b32.xlu0 %v166_v50, %s363_s8  ;;  %151 = vrot.lane.b32.xlu1 %v147_v51, %s364_s9  ;;  %v221_v4 = vmul.f32 %v220_v55, %v218_v3  ;;  %v276_v63 = vstv %s477_s1 }
  0x2f   :  { %207 = vrot.lane.b32.xlu0 %v202_v53, %s365_s11  ;;  %153 = vrot.lane.b32.xlu1 %v148_v52, %s364_s9 }
  0x33   :  { %227 = vrot.lane.b32.xlu0 %v222_v57, %s366_s12  ;;  %245 = vrot.lane.b32.xlu1 %v241_v58, %s367_s13 }
  0x37   :  { %247 = vrot.lane.b32.xlu0 %v242_v61, %s367_s13  ;;  %172 = vrot.lane.b32.xlu1 %v167_v62, %s363_s8 }
  0x3b   :  { %205 = vrot.lane.b32.xlu1 %v201_v1, %s365_s11  ;;  %265 = vrot.lane.b32.xlu0 %v260_v2, %s368_s14 }
  0x3f   :  { %225 = vrot.lane.b32.xlu1 %v221_v4, %s366_s12 }
  0x43   :  { %263 = vrot.lane.b32.xlu1 %v259_v5, %s368_s14 }
  0x90   :  { %v130_v6 = vpop.permute.xlu0 %129 }
  0x91   :  { %v133_v11 = vrot.slane %v130_v6, 4 }
  0x94   :  { %v132_v7 = vpop.permute.xlu0 %131 }
  0x95   :  { %v134_v12 = vrot.slane %v132_v7, 4  ;;  %v142_v25 = vadd.f32 %v132_v7, %v118_v17 }
  0x97   :  { %v136_v18 = vsel %vm135_vm4, %v133_v11, %v134_v12 }
  0x98   :  { %v189_v8 = vpop.permute.xlu0 %188  ;;  %v138_v24 = vsel %vm137_vm5, %v130_v6, %v136_v18 }
  0x99   :  { %v141_v28 = vadd.f32 %v138_v24, %v117_v22  ;;  %v190_v31 = vrot.slane %v189_v8, 4 }
  0x9b   :  { %v192_v41 = vsel %vm191_vm8, %v190_v31, %v189_v8 }
  0x9d   :  { %v152_v9 = vpop.permute.xlu1 %151  ;;  %v171_v10 = vpop.permute.xlu0 %170 }
  0x9e   :  { %v155_v19 = vrot.slane %v152_v9, 4  ;;  %v174_v29 = vrot.slane %v171_v10, 4 }
  0xa1   :  { %v154_v14 = vpop.permute.xlu1 %153  ;;  %v208_v20 = vpop.permute.xlu0 %207 }
  0xa2   :  { %v156_v16 = vrot.slane %v154_v14, 4  ;;  %v163_v32 = vadd.f32 %v154_v14, %v142_v25 }
  0xa4   :  { %v157_v23 = vsel %vm135_vm4, %v155_v19, %v156_v16 }
  0xa5   :  { %v246_v21 = vpop.permute.xlu1 %245  ;;  %v159_v26 = vsel %vm158_vm6, %v152_v9, %v157_v23  ;;  %v228_v33 = vpop.permute.xlu0 %227 }
  0xa6   :  { %v162_v35 = vadd.f32 %v159_v26, %v141_v28  ;;  %v249_v48 = vrot.slane %v246_v21, 4 }
  0xa8   :  { %v251_v58 = vsel %vm250_vm11, %v249_v48, %v246_v21 }
  0xa9   :  { %v173_v27 = vpop.permute.xlu1 %172  ;;  %v248_v45 = vpop.permute.xlu0 %247 }
  0xaa   :  { %v175_v30 = vrot.slane %v173_v27, 4  ;;  %v182_v36 = vadd.f32 %v173_v27, %v163_v32  ;;  %v252_v59 = vsel %vm250_vm11, %v249_v48, %v248_v45 }
  0xac   :  { %v176_v34 = vsel %vm135_vm4, %v174_v29, %v175_v30  ;;  %v196_v46 = vadd.f32 %v190_v31, %v182_v36 }
  0xad   :  { %v178_v37 = vsel %vm177_vm7, %v171_v10, %v176_v34  ;;  %v206_v38 = vpop.permute.xlu1 %205  ;;  %v266_v56 = vpop.permute.xlu0 %265 }
  0xae   :  { %v181_v39 = vadd.f32 %v178_v37, %v162_v35  ;;  %v209_v40 = vrot.slane %v206_v38, 4 }
  0xb0   :  { %v195_v42 = vadd.f32 %v192_v41, %v181_v39  ;;  %v211_v43 = vsel %vm210_vm9, %v209_v40, %v206_v38  ;;  %v212_v44 = vsel %vm210_vm9, %v209_v40, %v208_v20 }
  0xb1   :  { %v226_v47 = vpop.permute.xlu1 %225  ;;  %v216_v51 = vadd.f32 %v212_v44, %v196_v46 }
  0xb2   :  { %v215_v49 = vadd.f32 %v211_v43, %v195_v42  ;;  %v229_v50 = vrot.slane %v226_v47, 4 }
  0xb4   :  { %v231_v52 = vsel %vm230_vm10, %v229_v50, %v226_v47  ;;  %v232_v53 = vsel %vm230_vm10, %v229_v50, %v228_v33 }
  0xb5   :  { %v235_v54 = vadd.f32 %v231_v52, %v215_v49  ;;  %v264_v55 = vpop.permute.xlu1 %263  ;;  %v236_v57 = vadd.f32 %v232_v53, %v216_v51 }
  0xb6   :  { %v267_v60 = vrot.slane %v264_v55, 4 }
  0xb7   :  { %v255_v61 = vadd.f32 %v251_v58, %v235_v54  ;;  %v256_v62 = vadd.f32 %v252_v59, %v236_v57 }
  0xb8   :  { %v269_v0 = vsel %vm268_vm12, %v267_v60, %v264_v55  ;;  %v270_v1 = vsel %vm268_vm12, %v267_v60, %v266_v56 }
  0xb9   :  { %v273_v2 = vadd.f32 %v269_v0, %v255_v61  ;;  %v274_v3 = vadd.f32 %v270_v1, %v256_v62 }
  0xbb   :  { %v277_v4 = vadd.f32 %v276_v63, %v273_v2  ;;  %v278_v5 = vadd.f32 %v276_v63, %v274_v3 }
  0xbd   :  { %v279_v6 = vmax.f32 %v277_v4, 0.0  ;;  %v280_v7 = vmax.f32 %v278_v5, 0.0 }
  0xbf   :  { %v289_v8 = vrot.slane %v279_v6, %v411_v13  ;;  %v296_v9 = vrot.slane %v280_v7, %v411_v13 }
  0xc1   :  { %v305_v10 = vcombine.high %v289_v8, %v296_v9  ;;  %v297_v11 = vcombine.low %v289_v8, %v296_v9 }
  0xc3   :  { %306 = vrot.lane.b32.xlu0 %v305_v10, %s369_s18  ;;  %298 = vrot.lane.b32.xlu1 %v297_v11, %s369_s18 }
 0x135   :  { %v307_v12 = vpop.permute.xlu0 %306  ;;  %v299_v14 = vpop.permute.xlu1 %298 }
 0x136   :  { %v308_v15 = vrot.slane %v307_v12, 2  ;;  %v300_v16 = vrot.slane %v299_v14, 2 }
 0x138   :  { %v309_v17 = vsel %vm301_vm13, %v307_v12, %v308_v15  ;;  %v302_v18 = vsel %vm301_vm13, %v299_v14, %v300_v16 }
 0x139   :  { %311 = vst [vmem:[%s481_s5] sm:$0xf] %v309_v17  ;;  %304 = vst [vmem:[%s480_s4] sm:$0xf] %v302_v18 }
 0x13a   :  { %320 = vsyncpa [#allocation7], 1 }

</bundles_post_ra>
